<compile_context>
chip_gen: v7x
topology: tpu7x:2x2x1
jax: 0.10.0
libtpu: 0.0.40
codegen_flags: <defaults>
</compile_context>

<pallas_src>
import jax
import jax.numpy as jnp
from jax.experimental import pallas as pl
from jax.experimental.pallas import tpu as pltpu

LANE = 128
HIDDEN = 64
TB_CAP = 2048  # batch tile cap (review: 2048 good for v6e, within v7x's 2048-4096 range)


def _round_up(n, m):
    return ((n + m - 1) // m) * m


def actor_kernel(x_ref, w1_ref, b1_ref, w2_ref, b2_ref, w3_ref, b3_ref, o_ref):
    # x block: (TB, S) f32 -> bf16 in-kernel (no extra XLA pad/cast pass over HBM).
    # Weights bf16 (in, out); biases f32 (1, out). Accumulate + tanh in f32.
    x = x_ref[...].astype(w1_ref.dtype)
    h1 = jnp.tanh(
        jnp.dot(x, w1_ref[...], preferred_element_type=jnp.float32) + b1_ref[...]
    )
    h2 = jnp.tanh(
        jnp.dot(h1.astype(w2_ref.dtype), w2_ref[...],
                preferred_element_type=jnp.float32) + b2_ref[...]
    )
    o = jnp.tanh(
        jnp.dot(h2.astype(w3_ref.dtype), w3_ref[...],
                preferred_element_type=jnp.float32) + b3_ref[...]
    )
    o_ref[...] = o.astype(o_ref.dtype)  # bf16 store -> ~1/3 less HBM traffic


def prepare_actor_params(params, compute_dtype=jnp.bfloat16):
    """One-time weight prep: transpose to (in, out), cast, zero-pad out-dims to lane-full."""
    S = params["fc1_w"].shape[1]
    A = params["fc3_w"].shape[0]
    H_pad = _round_up(HIDDEN, LANE)
    A_pad = _round_up(A, LANE)

    def pad_w(w_t, rows, cols):  # w_t already (in, out)
        out = jnp.zeros((rows, cols), compute_dtype)
        return out.at[: w_t.shape[0], : w_t.shape[1]].set(w_t.astype(compute_dtype))

    def pad_b(b, cols):
        out = jnp.zeros((1, cols), jnp.float32)
        return out.at[0, : b.shape[0]].set(b.astype(jnp.float32))

    prepped = {
        # w1 keeps its true input dim S (no row padding): x is fed unpadded.
        "w1": pad_w(params["fc1_w"].T, S, H_pad),
        "b1": pad_b(params["fc1_b"], H_pad),
        "w2": pad_w(params["fc2_w"].T, H_pad, H_pad),
        "b2": pad_b(params["fc2_b"], H_pad),
        "w3": pad_w(params["fc3_w"].T, H_pad, A_pad),
        "b3": pad_b(params["fc3_b"], A_pad),
    }
    return prepped, S, A


def deterministic_actor_forward(x, prepped, state_dim, action_dim):
    """x: (B, state_dim) f32. Returns (B, action_dim) f32."""
    B, S = x.shape
    assert S == state_dim
    H_pad = prepped["w2"].shape[0]
    A_pad = prepped["w3"].shape[1]

    # Batch tile: no batch over-padding.
    #   B <= TB_CAP: single full-extent block (block dim == array dim, so the
    #                (8,128) rule is satisfied for any B).
    #   B >  TB_CAP: TB = TB_CAP (multiple of 8); ragged final block is masked
    #                by Pallas, rows are independent so real rows are exact.
    if B <= TB_CAP:
        TB = B
    else:
        TB = TB_CAP
    grid = (pl.cdiv(B, TB),)

    # Advisory cost hint based on *useful* work only (unpadded dims).
    flops = 2 * B * (S * HIDDEN + HIDDEN * HIDDEN + HIDDEN * action_dim)
    transcendentals = B * (2 * HIDDEN + action_dim)
    bytes_accessed = (
        x.size * x.dtype.itemsize
        + sum(prepped[k].size * prepped[k].dtype.itemsize
              for k in ("w1", "b1", "w2", "b2", "w3", "b3"))
        + B * A_pad * 2  # bf16 output writeback
    )

    out_padded = pl.pallas_call(
        actor_kernel,
        out_shape=jax.ShapeDtypeStruct((B, A_pad), jnp.bfloat16),
        grid=grid,
        in_specs=[
            pl.BlockSpec((TB, S), lambda i: (i, 0)),          # x: raw f32, tiled over batch
            pl.BlockSpec((S, H_pad), lambda i: (0, 0)),       # w1: resident
            pl.BlockSpec((1, H_pad), lambda i: (0, 0)),       # b1
            pl.BlockSpec((H_pad, H_pad), lambda i: (0, 0)),   # w2
            pl.BlockSpec((1, H_pad), lambda i: (0, 0)),       # b2
            pl.BlockSpec((H_pad, A_pad), lambda i: (0, 0)),   # w3
            pl.BlockSpec((1, A_pad), lambda i: (0, 0)),       # b3
        ],
        out_specs=pl.BlockSpec((TB, A_pad), lambda i: (i, 0)),  # lane-dense bf16 output
        compiler_params=pltpu.CompilerParams(
            dimension_semantics=("parallel",)),
        cost_estimate=pl.CostEstimate(
            flops=flops,
            transcendentals=transcendentals,
            bytes_accessed=bytes_accessed),
    )(x, prepped["w1"], prepped["b1"], prepped["w2"], prepped["b2"],
      prepped["w3"], prepped["b3"])

    # Tiny slice + cast back to f32 (B x A elements only).
    return out_padded[:, :action_dim].astype(jnp.float32)


def init_params(key, state_dim, action_dim):
    """Deterministic synthetic init matching nn.Linear parameter shapes."""
    S, A = state_dim[0], action_dim[0]
    ks = jax.random.split(key, 6)
    scale = 0.1
    return {
        "fc1_w": scale * jax.random.normal(ks[0], (HIDDEN, S), jnp.float32),
        "fc1_b": scale * jax.random.normal(ks[1], (HIDDEN,), jnp.float32),
        "fc2_w": scale * jax.random.normal(ks[2], (HIDDEN, HIDDEN), jnp.float32),
        "fc2_b": scale * jax.random.normal(ks[3], (HIDDEN,), jnp.float32),
        "fc3_w": scale * jax.random.normal(ks[4], (A, HIDDEN), jnp.float32),
        "fc3_b": scale * jax.random.normal(ks[5], (A,), jnp.float32),
    }


def reference_forward(x, params):
    """Pure-JAX f32 reference of the PyTorch forward (non-image path)."""
    h = jnp.tanh(x @ params["fc1_w"].T + params["fc1_b"])
    h = jnp.tanh(h @ params["fc2_w"].T + params["fc2_b"])
    return jnp.tanh(h @ params["fc3_w"].T + params["fc3_b"])


if __name__ == "__main__":
    key = jax.random.PRNGKey(0)
    state_dim = (32,)   # non-image observation
    action_dim = (8,)
    batch = 2

    k_x, k_p = jax.random.split(key)
    x = jax.random.normal(k_x, (batch, state_dim[0]), jnp.float32)
    params = init_params(k_p, state_dim, action_dim)

    # One-time weight preparation (transpose / pad / bf16 cast), not per-call.
    prepped, S, A = prepare_actor_params(params, compute_dtype=jnp.bfloat16)

    out = deterministic_actor_forward(x, prepped, S, A)
    out = jax.block_until_ready(out)

    ref = reference_forward(x, params)
    assert out.shape == (batch, action_dim[0])
    # bf16 matmul operands + bf16 output store with f32 accumulate:
    # loose-ish tolerance vs the pure-f32 reference (tanh output is in [-1,1]).
    assert jnp.allclose(out, ref, atol=2e-2, rtol=2e-2), "mismatch vs reference"

    print("KERNEL_OK")
</pallas_src>

<mosaic_0001>
module attributes {stable_mosaic.version = 11 : i64} {
  func.func @actor_kernel(%arg0: i32, %arg1: memref<2x32xf32, #tpu.memory_space<vmem>>, %arg2: memref<32x128xbf16, #tpu.memory_space<vmem>>, %arg3: memref<1x128xf32, #tpu.memory_space<vmem>>, %arg4: memref<128x128xbf16, #tpu.memory_space<vmem>>, %arg5: memref<1x128xf32, #tpu.memory_space<vmem>>, %arg6: memref<128x128xbf16, #tpu.memory_space<vmem>>, %arg7: memref<1x128xf32, #tpu.memory_space<vmem>>, %arg8: memref<2x128xbf16, #tpu.memory_space<vmem>>) attributes {dimension_semantics = [#tpu.dimension_semantics<parallel>], iteration_bounds = array<i64: 1>, scalar_prefetch = 0 : i64, scratch_operands = 0 : i64, tpu.core_type = #tpu.core_type<tc>, window_params = [{transform_indices = @transform_0, window_bounds = array<i64: 2, 32>}, {pipeline_mode = #tpu.pipeline_mode<synchronous>, transform_indices = @transform_1, window_bounds = array<i64: 32, 128>}, {pipeline_mode = #tpu.pipeline_mode<synchronous>, transform_indices = @transform_2, window_bounds = array<i64: 1, 128>}, {pipeline_mode = #tpu.pipeline_mode<synchronous>, transform_indices = @transform_3, window_bounds = array<i64: 128, 128>}, {pipeline_mode = #tpu.pipeline_mode<synchronous>, transform_indices = @transform_4, window_bounds = array<i64: 1, 128>}, {pipeline_mode = #tpu.pipeline_mode<synchronous>, transform_indices = @transform_5, window_bounds = array<i64: 128, 128>}, {pipeline_mode = #tpu.pipeline_mode<synchronous>, transform_indices = @transform_6, window_bounds = array<i64: 1, 128>}, {transform_indices = @transform_7, window_bounds = array<i64: 2, 128>}]} {
    %c0 = arith.constant 0 : index
    %c0_0 = arith.constant 0 : index
    %0 = vector.load %arg1[%c0, %c0_0] : memref<2x32xf32, #tpu.memory_space<vmem>>, vector<2x32xf32>
    %1 = arith.truncf %0 : vector<2x32xf32> to vector<2x32xbf16>
    %c0_1 = arith.constant 0 : index
    %c0_2 = arith.constant 0 : index
    %2 = vector.load %arg2[%c0_1, %c0_2] : memref<32x128xbf16, #tpu.memory_space<vmem>>, vector<32x128xbf16>
    %cst = arith.constant dense<0.000000e+00> : vector<2x128xf32>
    %3 = tpu.matmul %1, %2, %cst {dimension_numbers = #tpu.dot_dimension_numbers<[1], [0], [0], [1], [0, 0, 1, 1], [], []>} : vector<2x32xbf16>, vector<32x128xbf16>, vector<2x128xf32> -> vector<2x128xf32>
    %c0_3 = arith.constant 0 : index
    %c0_4 = arith.constant 0 : index
    %4 = vector.load %arg3[%c0_3, %c0_4] : memref<1x128xf32, #tpu.memory_space<vmem>>, vector<1x128xf32>
    %5 = vector.broadcast %4 : vector<1x128xf32> to vector<2x128xf32>
    %6 = arith.addf %3, %5 : vector<2x128xf32>
    %7 = math.tanh %6 : vector<2x128xf32>
    %8 = arith.truncf %7 : vector<2x128xf32> to vector<2x128xbf16>
    %c0_5 = arith.constant 0 : index
    %c0_6 = arith.constant 0 : index
    %9 = vector.load %arg4[%c0_5, %c0_6] : memref<128x128xbf16, #tpu.memory_space<vmem>>, vector<128x128xbf16>
    %cst_7 = arith.constant dense<0.000000e+00> : vector<2x128xf32>
    %10 = tpu.matmul %8, %9, %cst_7 {dimension_numbers = #tpu.dot_dimension_numbers<[1], [0], [0], [1], [0, 0, 1, 1], [], []>} : vector<2x128xbf16>, vector<128x128xbf16>, vector<2x128xf32> -> vector<2x128xf32>
    %c0_8 = arith.constant 0 : index
    %c0_9 = arith.constant 0 : index
    %11 = vector.load %arg5[%c0_8, %c0_9] : memref<1x128xf32, #tpu.memory_space<vmem>>, vector<1x128xf32>
    %12 = vector.broadcast %11 : vector<1x128xf32> to vector<2x128xf32>
    %13 = arith.addf %10, %12 : vector<2x128xf32>
    %14 = math.tanh %13 : vector<2x128xf32>
    %15 = arith.truncf %14 : vector<2x128xf32> to vector<2x128xbf16>
    %c0_10 = arith.constant 0 : index
    %c0_11 = arith.constant 0 : index
    %16 = vector.load %arg6[%c0_10, %c0_11] : memref<128x128xbf16, #tpu.memory_space<vmem>>, vector<128x128xbf16>
    %cst_12 = arith.constant dense<0.000000e+00> : vector<2x128xf32>
    %17 = tpu.matmul %15, %16, %cst_12 {dimension_numbers = #tpu.dot_dimension_numbers<[1], [0], [0], [1], [0, 0, 1, 1], [], []>} : vector<2x128xbf16>, vector<128x128xbf16>, vector<2x128xf32> -> vector<2x128xf32>
    %c0_13 = arith.constant 0 : index
    %c0_14 = arith.constant 0 : index
    %18 = vector.load %arg7[%c0_13, %c0_14] : memref<1x128xf32, #tpu.memory_space<vmem>>, vector<1x128xf32>
    %19 = vector.broadcast %18 : vector<1x128xf32> to vector<2x128xf32>
    %20 = arith.addf %17, %19 : vector<2x128xf32>
    %21 = math.tanh %20 : vector<2x128xf32>
    %22 = arith.truncf %21 : vector<2x128xf32> to vector<2x128xbf16>
    %c0_15 = arith.constant 0 : index
    %c0_16 = arith.constant 0 : index
    %23 = vector.load %arg8[%c0_15, %c0_16] : memref<2x128xbf16, #tpu.memory_space<vmem>>, vector<2x128xbf16>
    tpu.vector_store %arg8[%c0_15, %c0_16], %22 {strides = array<i32>} : memref<2x128xbf16, #tpu.memory_space<vmem>>, vector<2x128xbf16>,
    return
  }
  func.func @transform_0(%arg0: i32) -> (i32, i32) {
    %c0_i32 = arith.constant 0 : i32
    %c0_i32_0 = arith.constant 0 : i32
    return %arg0, %c0_i32 : i32, i32
  }
  func.func @transform_1(%arg0: i32) -> (i32, i32) {
    %c0_i32 = arith.constant 0 : i32
    %c0_i32_0 = arith.constant 0 : i32
    %c0_i32_1 = arith.constant 0 : i32
    return %c0_i32, %c0_i32_0 : i32, i32
  }
  func.func @transform_2(%arg0: i32) -> (i32, i32) {
    %c0_i32 = arith.constant 0 : i32
    %c0_i32_0 = arith.constant 0 : i32
    %c0_i32_1 = arith.constant 0 : i32
    return %c0_i32, %c0_i32_0 : i32, i32
  }
  func.func @transform_3(%arg0: i32) -> (i32, i32) {
    %c0_i32 = arith.constant 0 : i32
    %c0_i32_0 = arith.constant 0 : i32
    %c0_i32_1 = arith.constant 0 : i32
    return %c0_i32, %c0_i32_0 : i32, i32
  }
  func.func @transform_4(%arg0: i32) -> (i32, i32) {
    %c0_i32 = arith.constant 0 : i32
    %c0_i32_0 = arith.constant 0 : i32
    %c0_i32_1 = arith.constant 0 : i32
    return %c0_i32, %c0_i32_0 : i32, i32
  }
  func.func @transform_5(%arg0: i32) -> (i32, i32) {
    %c0_i32 = arith.constant 0 : i32
    %c0_i32_0 = arith.constant 0 : i32
    %c0_i32_1 = arith.constant 0 : i32
    return %c0_i32, %c0_i32_0 : i32, i32
  }
  func.func @transform_6(%arg0: i32) -> (i32, i32) {
    %c0_i32 = arith.constant 0 : i32
    %c0_i32_0 = arith.constant 0 : i32
    %c0_i32_1 = arith.constant 0 : i32
    return %c0_i32, %c0_i32_0 : i32, i32
  }
  func.func @transform_7(%arg0: i32) -> (i32, i32) {
    %c0_i32 = arith.constant 0 : i32
    %c0_i32_0 = arith.constant 0 : i32
    return %arg0, %c0_i32 : i32, i32
  }
}

</mosaic_0001>

<bundles_post_ra>
// kernel: tpu_custom_call.1
= control target key start
LH: loop header
LB: loop body
LE: loop exit
PB: predicated region body
PF: predicated region fallthrough
CT: control target
= control target key end

     0   :  { %12 = vsyncpa [#allocation3], 0  ;;  %s789_s0 = inlined_call_operand.hbm [shape: f32[2,32], index: 0, kind: input, shape index: {}]   ;;  %s790_s1 = inlined_call_operand.hbm [shape: bf16[32,128], index: 1, kind: input, shape index: {}]   ;;  %s791_s2 = inlined_call_operand.vmem [shape: f32[1,128], index: 2, kind: input, shape index: {}]   ;;  %s792_s3 = inlined_call_operand.hbm [shape: bf16[128,128], index: 3, kind: input, shape index: {}]   ;;  %s793_s4 = inlined_call_operand.vmem [shape: f32[1,128], index: 4, kind: input, shape index: {}]   ;;  %s794_s5 = inlined_call_operand.hbm [shape: bf16[128,128], index: 5, kind: input, shape index: {}]   ;;  %s795_s6 = inlined_call_operand.vmem [shape: f32[1,128], index: 6, kind: input, shape index: {}]   ;;  %s796_s7 = inlined_call_operand.hbm [shape: bf16[2,128], index: 7, kind: output, shape index: {}]  }
   0x1   :  { %13 = vsyncpa [#allocation6], 0 }
   0x2   :  { %14 = vsyncpa [#allocation9], 0 }
   0x3   :  { %15 = vsyncpa [#allocation4], 0  ;;  %s638_s24 = smov [#allocation5]   ;;  %s520_s28 = scalar_lea.hbm %s790_s1, 256 }
   0x4   :  { %s31_s25 = sshll.u32 %s638_s24, 4  ;;  %p521_p0 = scmp.ne.s32.totalorder %s790_s1, %s520_s28  ;;  %s32_s25 = int_to_ptr.vmem [resolvable:$true] %s31_s25 }
   0x5   :  { %p524_p1 = scmp.lt.u32.totalorder %s520_s28, %s790_s1 }
   0x7   :  { %p526_p2 = pnand %p524_p1, %p521_p0 }
   0x9   :  { %529 = shalt.err (!%p526_p2)
}
   0xa   :  { %s530_s10 = scalar_lea.vmem %s32_s25, 256  ;;  %p535_p4 = scmp.lt.s32.totalorder %s32_s25, %s32_s25 }
   0xb   :  { %p531_p3 = scmp.ne.s32.totalorder %s32_s25, %s530_s10  ;;  %p536_p5 = scmp.lt.s32.totalorder %s530_s10, %s530_s10 }
   0xd   :  { %p537_p6 = por %p536_p5, %p535_p4 }
   0xf   :  { %p538_p7 = pnand %p537_p6, %p531_p3 }
  0x11   :  { %541 = shalt.err (!%p538_p7)
}
  0x12   :  { %s639_s11 = smov 64   ;;  %s640_s12 = smov 4  }
  0x13   :  { %37 = dma.hbm_to_vmem [thread:$0]  %s790_s1, 256, %s32_s25, [#allocation6], %s639_s11, %s639_s11, %s640_s12  }
  0x14   :  { %s641_s15 = smov [#allocation2]   ;;  %s642_s17 = smov [#allocation7]  }
  0x15   :  { %s22_s16 = sshll.u32 %s641_s15, 4  ;;  %s45_s18 = sshll.u32 %s642_s17, 4  ;;  %s23_s16 = int_to_ptr.vmem [resolvable:$true] %s22_s16  ;;  %s46_s18 = int_to_ptr.vmem [resolvable:$true] %s45_s18 }
  0x16   :  { %s542_s21 = scalar_lea.hbm %s789_s0, 32 }
  0x17   :  { %p543_p8 = scmp.ne.s32.totalorder %s789_s0, %s542_s21  ;;  %p546_p9 = scmp.lt.u32.totalorder %s542_s21, %s789_s0 }
  0x19   :  { %p548_p10 = pnand %p546_p9, %p543_p8 }
  0x1b   :  { %551 = shalt.err (!%p548_p10)
}
  0x1c   :  { %s552_s1 = scalar_lea.vmem %s23_s16, 32  ;;  %p557_p12 = scmp.lt.s32.totalorder %s23_s16, %s23_s16 }
  0x1d   :  { %p553_p11 = scmp.ne.s32.totalorder %s23_s16, %s552_s1  ;;  %p558_p13 = scmp.lt.s32.totalorder %s552_s1, %s552_s1 }
  0x1f   :  { %p559_p0 = por %p558_p13, %p557_p12 }
  0x21   :  { %p560_p1 = pnand %p559_p0, %p553_p11 }
  0x23   :  { %563 = shalt.err (!%p560_p1)
}
  0x24   :  { %25 = dma.hbm_to_vmem [thread:$0]  %s789_s0, 32, %s23_s16, [#allocation3]  }
  0x25   :  { %s564_s30 = scalar_lea.hbm %s792_s3, 1024 }
  0x26   :  { %p565_p2 = scmp.ne.s32.totalorder %s792_s3, %s564_s30  ;;  %p568_p3 = scmp.lt.u32.totalorder %s564_s30, %s792_s3 }
  0x28   :  { %p570_p4 = pnand %p568_p3, %p565_p2 }
  0x2a   :  { %573 = shalt.err (!%p570_p4)
}
  0x2b   :  { %s574_s14 = scalar_lea.vmem %s46_s18, 1024  ;;  %p579_p6 = scmp.lt.s32.totalorder %s46_s18, %s46_s18 }
  0x2c   :  { %p575_p5 = scmp.ne.s32.totalorder %s46_s18, %s574_s14  ;;  %p580_p7 = scmp.lt.s32.totalorder %s574_s14, %s574_s14 }
  0x2e   :  { %p581_p8 = por %p580_p7, %p579_p6 }
  0x30   :  { %p582_p9 = pnand %p581_p8, %p575_p5 }
  0x32   :  { %585 = shalt.err (!%p582_p9)
}
  0x33   :  { %51 = dma.hbm_to_vmem [thread:$0]  %s792_s3, 1024, %s46_s18, [#allocation6], %s639_s11, %s639_s11, %s640_s12  }
  0x34   :  { %s643_s16 = smov [#allocation8]   ;;  %s586_s21 = scalar_lea.hbm %s794_s5, 1024 }
  0x35   :  { %s59_s17 = sshll.u32 %s643_s16, 4  ;;  %p587_p10 = scmp.ne.s32.totalorder %s794_s5, %s586_s21  ;;  %s60_s17 = int_to_ptr.vmem [resolvable:$true] %s59_s17 }
  0x36   :  { %p590_p11 = scmp.lt.u32.totalorder %s586_s21, %s794_s5 }
  0x38   :  { %p592_p12 = pnand %p590_p11, %p587_p10 }
  0x3a   :  { %595 = shalt.err (!%p592_p12)
}
  0x3b   :  { %s596_s1 = scalar_lea.vmem %s60_s17, 1024  ;;  %p601_p0 = scmp.lt.s32.totalorder %s60_s17, %s60_s17 }
  0x3c   :  { %p597_p13 = scmp.ne.s32.totalorder %s60_s17, %s596_s1  ;;  %p602_p1 = scmp.lt.s32.totalorder %s596_s1, %s596_s1 }
  0x3e   :  { %p603_p2 = por %p602_p1, %p601_p0 }
  0x40   :  { %p604_p3 = pnand %p603_p2, %p597_p13 }
  0x42   :  { %607 = shalt.err (!%p604_p3)
}
  0x43   :  { %65 = dma.hbm_to_vmem [thread:$0]  %s794_s5, 1024, %s60_s17, [#allocation9], %s639_s11, %s639_s11, %s640_s12  }
  0x44   :  { %630 = dma.done.wait [#allocation3], 32  }
  0x45   :  { %631 = vsyncadd [#allocation3], 4294967264 }
  0x46   :  { %632 = dma.done.wait [#allocation6], 1280  }
  0x47   :  { %633 = vsyncadd [#allocation6], 4294966016 }
  0x48   :  { %634 = dma.done.wait [#allocation9], 1024  }
  0x49   :  { %635 = vsyncadd [#allocation9], 4294966272  ;;  %v644_v0 = vmov 0.0   ;;  %vm645_vm0 = vmmov 0   ;;  %v496_v1 = vld [vmem:[#allocation5] sm:$0xff]   ;;  %v497_v2 = vld [vmem:[#allocation5 + $0x8] sm:$0xff]  }
  0x4a   :  { %439 = vmatprep.subr.bf16.mxu0 %v644_v0  ;;  %443 = vmatprep.mubr.msk.bf16.mxu0 %vm645_vm0, %v644_v0  ;;  %v81_v3 = vld [vmem:[#allocation2] sm:$0x3]  ;;  %v498_v4 = vld [vmem:[#allocation7] sm:$0xff]   ;;  %vm106_vm1 = vcmask 261120   ;;  %v500_v7 = vld [vmem:[#allocation7 + $0x10] sm:$0xff]  }
  0x4b   :  { %447 = vmatprep.subr.bf16.mxu1 %v644_v0  ;;  %463 = vmatprep.mubr.msk.bf16.mxu1 %vm645_vm0, %v644_v0  ;;  %v82_v5 = vpack.c.bf16 %v81_v3, %v81_v3  ;;  %v499_v6 = vld [vmem:[#allocation7 + $0x8] sm:$0xff]   ;;  %v501_v8 = vld [vmem:[#allocation7 + $0x18] sm:$0xff]   ;;  %v502_v9 = vld [vmem:[#allocation7 + $0x20] sm:$0xff]  }
  0x4c   :  { %440 = vmatpush3.bf16.msra.mxu0 %v496_v1  ;;  %448 = vmatpush3.bf16.msra.mxu1 %v498_v4  ;;  %v503_v10 = vld [vmem:[#allocation7 + $0x28] sm:$0xff]   ;;  %v504_v11 = vld [vmem:[#allocation7 + $0x30] sm:$0xff]   ;;  %v505_v12 = vld [vmem:[#allocation7 + $0x38] sm:$0xff]  }
  0x4d   :  { %441 = vmatprep.subr.bf16.mxu0 %v644_v0  ;;  %449 = vmatprep.subr.bf16.mxu1 %v644_v0  ;;  %v506_v13 = vld [vmem:[#allocation8] sm:$0xff]   ;;  %v507_v14 = vld [vmem:[#allocation8 + $0x8] sm:$0xff]   ;;  %v508_v15 = vld [vmem:[#allocation8 + $0x10] sm:$0xff]  }
  0x4e   :  { %v509_v16 = vld [vmem:[#allocation8 + $0x18] sm:$0xff]   ;;  %v396_v17 = vld [vmem:[%s791_s2] ss:$0 sm:$0xff]  ;;  %v510_v25 = vld [vmem:[#allocation8 + $0x20] sm:$0xff]  }
  0x4f   :  { %v511_v26 = vld [vmem:[#allocation8 + $0x28] sm:$0xff]   ;;  %v512_v27 = vld [vmem:[#allocation8 + $0x30] sm:$0xff]   ;;  %v513_v28 = vld [vmem:[#allocation8 + $0x38] sm:$0xff]  }
  0x50   :  { %442 = vmatpush3.bf16.msra.mxu0 %v497_v2  ;;  %450 = vmatpush3.bf16.msra.mxu1 %v499_v6  ;;  %v400_v29 = vld [vmem:[%s793_s4] ss:$0 sm:$0xff]  ;;  %s646_s4 = smov [#allocation10]  }
  0x51   :  { %467 = vmatprep.subr.bf16.mxu0 %v644_v0  ;;  %451 = vmatprep.subr.bf16.mxu1 %v644_v0  ;;  %v409_v37 = vld [vmem:[%s795_s6] ss:$0 sm:$0xff]  ;;  %s385_s28 = sshll.u32 %s646_s4, 4  ;;  %s386_s28 = int_to_ptr.vmem [resolvable:$true] %s385_s28 }
  0x52   :  { %s608_s29 = scalar_lea.vmem %s386_s28, 16  ;;  %s612_s30 = scalar_lea.vmem %s386_s28, 32 }
  0x53   :  { %444 = vmatmul.mubr.msk.bf16.vlgmr.msra.gmra.mrb[0].mxu0 %vm106_vm1, %v82_v5  ;;  %p609_p4 = scmp.ne.s32.totalorder %s386_s28, %s608_s29  ;;  %p613_p5 = scmp.lt.s32.totalorder %s386_s28, %s386_s28 }
  0x54   :  { %483 = vmatprep.mubr.msk.bf16.mxu0 %vm645_vm0, %v644_v0  ;;  %452 = vmatpush3.bf16.msra.mxu1 %v500_v7  ;;  %p614_p6 = scmp.lt.s32.totalorder %s612_s30, %s608_s29 }
  0x55   :  { %453 = vmatprep.subr.bf16.mxu1 %v644_v0  ;;  %468 = vmatpush3.bf16.msra.mxu0 %v506_v13 }
  0x56   :  { %469 = vmatprep.subr.bf16.mxu0 %v644_v0  ;;  %p615_p7 = por %p614_p6, %p613_p5 }
  0x58   :  { %454 = vmatpush3.bf16.msra.mxu1 %v501_v8  ;;  %p616_p8 = pnand %p615_p7, %p609_p4 }
  0x59   :  { %455 = vmatprep.subr.bf16.mxu1 %v644_v0  ;;  %470 = vmatpush3.bf16.msra.mxu0 %v507_v14 }
  0x5a   :  { %471 = vmatprep.subr.bf16.mxu0 %v644_v0 }
  0x5c   :  { %456 = vmatpush3.bf16.msra.mxu1 %v502_v9 }
  0x5d   :  { %457 = vmatprep.subr.bf16.mxu1 %v644_v0  ;;  %472 = vmatpush3.bf16.msra.mxu0 %v508_v15 }
  0x5e   :  { %473 = vmatprep.subr.bf16.mxu0 %v644_v0 }
  0x60   :  { %458 = vmatpush3.bf16.msra.mxu1 %v503_v10 }
  0x61   :  { %459 = vmatprep.subr.bf16.mxu1 %v644_v0  ;;  %474 = vmatpush3.bf16.msra.mxu0 %v509_v16 }
  0x62   :  { %475 = vmatprep.subr.bf16.mxu0 %v644_v0 }
  0x64   :  { %460 = vmatpush3.bf16.msra.mxu1 %v504_v11 }
  0x65   :  { %461 = vmatprep.subr.bf16.mxu1 %v644_v0  ;;  %476 = vmatpush3.bf16.msra.mxu0 %v510_v25 }
  0x66   :  { %477 = vmatprep.subr.bf16.mxu0 %v644_v0 }
  0x68   :  { %462 = vmatpush3.bf16.msra.mxu1 %v505_v12 }
  0x69   :  { %478 = vmatpush3.bf16.msra.mxu0 %v511_v26 }
  0x6a   :  { %479 = vmatprep.subr.bf16.mxu0 %v644_v0 }
  0x6d   :  { %480 = vmatpush3.bf16.msra.mxu0 %v512_v27 }
  0x6e   :  { %481 = vmatprep.subr.bf16.mxu0 %v644_v0 }
  0x71   :  { %482 = vmatpush3.bf16.msra.mxu0 %v513_v28 }
 0x126   :  { %v144_v18 = vpop.f32.mrb[0].mxu0 }
 0x127   :  { %v145_v19 = vadd.f32 %v396_v17, %v144_v18  ;;  %v445_v20 = vpop.f32.mrb[1].mxu0 }
 0x128   :  { %v147_v21 = vpop.f32.mrb[2].mxu0 }
 0x129   :  { %514 = vtanh.f32 %v145_v19  ;;  %v446_v22 = vpop.f32.mrb[3].mxu0 }
 0x133   :  { %v515_v23 = vpop.eup %514 }
 0x134   :  { %v151_v24 = vpack.c.bf16 %v515_v23, %v515_v23 }
 0x136   :  { %464 = vmatmul.mubr.bf16.vlgmr.msra.gmra.mrb[0].mxu1 %v151_v24 }
 0x209   :  { %v257_v30 = vpop.f32.mrb[0].mxu1 }
 0x20a   :  { %v258_v31 = vadd.f32 %v400_v29, %v257_v30  ;;  %v465_v32 = vpop.f32.mrb[1].mxu1 }
 0x20b   :  { %v260_v33 = vpop.f32.mrb[2].mxu1 }
 0x20c   :  { %516 = vtanh.f32 %v258_v31  ;;  %v466_v34 = vpop.f32.mrb[3].mxu1 }
 0x216   :  { %v517_v35 = vpop.eup %516 }
 0x217   :  { %v264_v36 = vpack.c.bf16 %v517_v35, %v517_v35 }
 0x219   :  { %484 = vmatmul.mubr.bf16.vlgmr.msra.gmra.mrb[4].mxu0 %v264_v36 }
 0x2ec   :  { %v370_v38 = vpop.f32.mrb[4].mxu0 }
 0x2ed   :  { %v371_v39 = vadd.f32 %v409_v37, %v370_v38  ;;  %v485_v40 = vpop.f32.mrb[5].mxu0 }
 0x2ee   :  { %v373_v41 = vpop.f32.mrb[6].mxu0 }
 0x2ef   :  { %518 = vtanh.f32 %v371_v39  ;;  %v486_v42 = vpop.f32.mrb[7].mxu0 }
 0x2f9   :  { %v519_v43 = vpop.eup %518 }
 0x2fa   :  { %v377_v44 = vpack.c.bf16 %v519_v43, %v519_v43 }
 0x2fc   :  { %378 = vst [vmem:[#allocation10] sm:$0x1] %v377_v44 }
 0x2fd   :  { %619 = shalt.err (!%p616_p8)
}
 0x2fe   :  { %s620_s9 = scalar_lea.hbm %s796_s7, 16 }
 0x2ff   :  { %p621_p9 = scmp.ne.s32.totalorder %s796_s7, %s620_s9  ;;  %p624_p10 = scmp.lt.u32.totalorder %s620_s9, %s796_s7 }
 0x301   :  { %p626_p11 = pnand %p624_p10, %p621_p9 }
 0x303   :  { %629 = shalt.err (!%p626_p11)
}
 0x304   :  { %388 = dma.vmem_to_hbm [thread:$0]  %s386_s28, 16, %s796_s7, [#allocation4]  }
 0x305   :  { %636 = dma.done.wait [#allocation4], 16  }
 0x306   :  { %637 = vsyncadd [#allocation4], 4294967280 }
 0x307   :  { %392 = vsyncpa [#allocation3], 1 }
 0x308   :  { %393 = vsyncpa [#allocation6], 1 }
 0x309   :  { %394 = vsyncpa [#allocation9], 1 }
 0x30a   :  { %395 = vsyncpa [#allocation4], 1 }

</bundles_post_ra>
